<compile_context>
chip_gen: v7x
topology: tpu7x:2x2x1
jax: 0.10.0
libtpu: 0.0.40
codegen_flags: <defaults>
</compile_context>

<pallas_src>
import functools

import jax
import jax.numpy as jnp
from jax.experimental import pallas as pl
from jax.experimental.pallas import tpu as pltpu


LANE = 128  # TPU lane width


def _round_up(x, m):
    return (x + m - 1) // m * m


def _tpu_generation():
    """Best-effort generation detection; conservative fallback if unknown."""
    try:
        kind = jax.devices()[0].device_kind.lower()
    except Exception:
        kind = ""
    if "v5 lite" in kind or "v5e" in kind or "v5lite" in kind:
        return dict(mxu_rows=128, tensorcores=1, vmem_cap=100 << 20)
    if "v7" in kind:
        return dict(mxu_rows=256, tensorcores=2, vmem_cap=56 << 20)
    if "v6" in kind:
        return dict(mxu_rows=256, tensorcores=1, vmem_cap=100 << 20)
    # Unknown chip: assume 2 cores (harmless) and the small (v7x) VMEM cap.
    return dict(mxu_rows=256, tensorcores=2, vmem_cap=56 << 20)


def _pick_tm(M, info):
    """Row-tile size.

    * Single grid step for small M (grid is a serial loop on 1-TC chips, and
      each extra step costs ~0.35us).
    * Split into >=2 steps only when the chip has 2 TensorCores AND each half
      is still at least one full MXU row tile.
    * Large tiles are MXU-row-cadence multiples (256 on v6e/v7x, 128 on v5e).
    """
    m8 = _round_up(max(M, 8), 8)
    mxu = info["mxu_rows"]
    cap = 512  # multiple of both 128 and 256
    if info["tensorcores"] >= 2 and m8 >= 2 * mxu:
        return min(cap, _round_up(pl.cdiv(m8, 2), mxu))
    if m8 <= cap:
        return m8
    return cap


def _mlp_kernel(*refs, num_layers):
    # refs = x_ref, w0, b0, w1, b1, ..., w_{L-1}, b_{L-1}, o_ref
    x_ref = refs[0]
    o_ref = refs[1 + 2 * num_layers]
    h = x_ref[...]                                   # f32 activations
    for i in range(num_layers):
        w = refs[1 + 2 * i][...]                     # bf16 (K_i, N_i), resident
        b = refs[2 + 2 * i][...]                     # f32  (1,  N_i), resident
        # bf16 MXU matmul with f32 accumulation; bias-add / ReLU stay in f32.
        h = jnp.dot(h.astype(jnp.bfloat16), w,
                    preferred_element_type=jnp.float32) + b
        if i < num_layers - 1:
            h = jnp.maximum(h, 0.0)
    o_ref[...] = h.astype(o_ref.dtype)


def _mlp_pallas_call(x2d, prepared_params, tm, info, single_buffer_weights):
    M, K0 = x2d.shape                                # M already a multiple of tm
    num_layers = len(prepared_params)
    n_last = prepared_params[-1][0].shape[1]
    grid = (M // tm,)

    in_specs = [pl.BlockSpec((tm, K0), lambda i: (i, 0))]
    flat_inputs = [x2d]
    for w, b in prepared_params:
        k, n = w.shape
        if single_buffer_weights:
            # Constant index_map -> never re-DMAed; second pipeline buffer is waste.
            w_spec = pl.BlockSpec((k, n), lambda i: (0, 0),
                                  pipeline_mode=pl.Buffered(1))
            b_spec = pl.BlockSpec((1, n), lambda i: (0, 0),
                                  pipeline_mode=pl.Buffered(1))
        else:
            w_spec = pl.BlockSpec((k, n), lambda i: (0, 0))
            b_spec = pl.BlockSpec((1, n), lambda i: (0, 0))
        in_specs += [w_spec, b_spec]
        flat_inputs += [w, b]
    out_spec = pl.BlockSpec((tm, n_last), lambda i: (i, 0))

    # --- VMEM budget -------------------------------------------------------
    wbuf = 1 if single_buffer_weights else 2
    weight_bytes = sum(w.size * w.dtype.itemsize + b.size * b.dtype.itemsize
                       for w, b in prepared_params)
    max_n = max(w.shape[1] for w, _ in prepared_params)
    io_bytes = 2 * (tm * K0 + tm * n_last) * 4       # double-buffered in/out tiles
    act_bytes = 2 * tm * max_n * 4                   # live f32 intermediates per dot
    need = wbuf * weight_bytes + io_bytes + act_bytes + (4 << 20)  # +headroom
    vmem_limit = int(min(info["vmem_cap"], max(32 << 20, need)))
    # TODO(synk): if wbuf*weight_bytes exceeds ~40 MiB (large FFNs on v7x), switch
    # to a hidden-dim-tiled variant with an f32 VMEM accumulator instead of
    # keeping every layer's weights resident.

    flops = 2 * M * sum(w.shape[0] * w.shape[1] for w, _ in prepared_params)
    bytes_accessed = x2d.size * 4 + M * n_last * 4 + weight_bytes

    kernel = functools.partial(_mlp_kernel, num_layers=num_layers)
    return pl.pallas_call(
        kernel,
        out_shape=jax.ShapeDtypeStruct((M, n_last), x2d.dtype),
        grid_spec=pltpu.PrefetchScalarGridSpec(
            num_scalar_prefetch=0,
            grid=grid,
            in_specs=in_specs,
            out_specs=out_spec,
        ),
        compiler_params=pltpu.CompilerParams(
            dimension_semantics=("parallel",),
            vmem_limit_bytes=vmem_limit),
        cost_estimate=pl.CostEstimate(
            flops=flops, transcendentals=0, bytes_accessed=bytes_accessed),
    )(*flat_inputs)


def mlp_fused_pallas(x2d, prepared_params, tm, info):
    try:
        return _mlp_pallas_call(x2d, prepared_params, tm, info,
                                single_buffer_weights=True)
    except Exception:
        # Fall back to default double-buffered resident weights if this JAX
        # build rejects pipeline_mode=pl.Buffered(1) on the top-level pipeline.
        return _mlp_pallas_call(x2d, prepared_params, tm, info,
                                single_buffer_weights=False)


def init_mlp_params(key, input_dim, hidden_dim, output_dim, num_layers):
    """Deterministic params matching nn.Linear shapes: weight (out, in), bias (out,)."""
    h = [hidden_dim] * (num_layers - 1)
    dims_in = [input_dim] + h
    dims_out = h + [output_dim]
    params = []
    for n, k in zip(dims_in, dims_out):
        key, kw, kb = jax.random.split(key, 3)
        bound = 1.0 / (n ** 0.5)  # PyTorch default uniform init bound
        w = jax.random.uniform(kw, (k, n), jnp.float32, -bound, bound)
        b = jax.random.uniform(kb, (k,), jnp.float32, -bound, bound)
        params.append((w, b))
    return params


def prepare_mlp_params(params):
    """One-time prep: transpose nn.Linear weights to (in, out), cast to bf16,
    and zero-pad every feature dim (layer-0 K included) to a multiple of 128
    for lane-dense MXU matmuls, DMAs and stores.  Biases stay f32."""
    prepared = []
    prev_out_pad = None
    for i, (w, b) in enumerate(params):
        out_dim, in_dim = w.shape
        k = _round_up(in_dim, LANE) if i == 0 else prev_out_pad
        n = _round_up(out_dim, LANE)
        w_kn = (jnp.zeros((k, n), jnp.bfloat16)
                .at[:in_dim, :out_dim].set(w.T.astype(jnp.bfloat16)))
        b_pad = jnp.zeros((1, n), jnp.float32).at[0, :out_dim].set(b)
        prepared.append((w_kn, b_pad))
        prev_out_pad = n
    true_output_dim = params[-1][0].shape[0]
    return prepared, true_output_dim


def mlp_forward(x, prepared_params, output_dim):
    """x: (..., input_dim) -> (..., output_dim), matching the PyTorch MLP."""
    lead_shape = x.shape[:-1]
    x2d = x.reshape(-1, x.shape[-1])
    M, K = x2d.shape
    k0_pad = prepared_params[0][0].shape[0]

    info = _tpu_generation()
    tm = _pick_tm(M, info)
    m_pad = _round_up(M, tm)                 # no ragged last tile

    if m_pad != M or k0_pad != K:
        xp = jnp.zeros((m_pad, k0_pad), x2d.dtype).at[:M, :K].set(x2d)
    else:
        xp = x2d

    y = mlp_fused_pallas(xp, prepared_params, tm, info)
    # TODO(synk): downstream consumers could take the 128-padded output layout
    # directly and avoid this extra un-pad copy of the result.
    return y[:M, :output_dim].reshape(*lead_shape, output_dim)


def mlp_reference(x, params):
    """Pure-JAX reference with the same bf16-matmul / f32-accumulate recipe."""
    h = x
    for i, (w, b) in enumerate(params):
        h = jnp.dot(h.astype(jnp.bfloat16), w.T.astype(jnp.bfloat16),
                    preferred_element_type=jnp.float32) + b
        if i < len(params) - 1:
            h = jnp.maximum(h, 0.0)
    return h


if __name__ == "__main__":
    key = jax.random.PRNGKey(0)
    batch, seq = 2, 8
    input_dim, hidden_dim, output_dim, num_layers = 32, 64, 16, 3

    kx, kp = jax.random.split(key)
    x = jax.random.normal(kx, (batch, seq, input_dim), jnp.float32)
    params = init_mlp_params(kp, input_dim, hidden_dim, output_dim, num_layers)

    # One-time parameter preparation (transpose + bf16 + pad); not per forward.
    prepared, out_dim = prepare_mlp_params(params)

    out = mlp_forward(x, prepared, out_dim)
    out = jax.block_until_ready(out)

    ref = mlp_reference(x, params)
    assert out.shape == (batch, seq, output_dim)
    assert jnp.allclose(out, ref, atol=1e-3, rtol=1e-3)

    print("KERNEL_OK")
</pallas_src>

<mosaic_0001>
module attributes {stable_mosaic.version = 11 : i64} {
  func.func @_mlp_kernel(%arg0: i32, %arg1: memref<16x128xf32, #tpu.memory_space<vmem>>, %arg2: memref<128x128xbf16, #tpu.memory_space<vmem>>, %arg3: memref<1x128xf32, #tpu.memory_space<vmem>>, %arg4: memref<128x128xbf16, #tpu.memory_space<vmem>>, %arg5: memref<1x128xf32, #tpu.memory_space<vmem>>, %arg6: memref<128x128xbf16, #tpu.memory_space<vmem>>, %arg7: memref<1x128xf32, #tpu.memory_space<vmem>>, %arg8: memref<16x128xf32, #tpu.memory_space<vmem>>) attributes {dimension_semantics = [#tpu.dimension_semantics<parallel>], iteration_bounds = array<i64: 1>, scalar_prefetch = 0 : i64, scratch_operands = 0 : i64, tpu.core_type = #tpu.core_type<tc>, window_params = [{transform_indices = @transform_0, window_bounds = array<i64: 16, 128>}, {pipeline_mode = #tpu.pipeline_mode<synchronous>, transform_indices = @transform_1, window_bounds = array<i64: 128, 128>}, {pipeline_mode = #tpu.pipeline_mode<synchronous>, transform_indices = @transform_2, window_bounds = array<i64: 1, 128>}, {pipeline_mode = #tpu.pipeline_mode<synchronous>, transform_indices = @transform_3, window_bounds = array<i64: 128, 128>}, {pipeline_mode = #tpu.pipeline_mode<synchronous>, transform_indices = @transform_4, window_bounds = array<i64: 1, 128>}, {pipeline_mode = #tpu.pipeline_mode<synchronous>, transform_indices = @transform_5, window_bounds = array<i64: 128, 128>}, {pipeline_mode = #tpu.pipeline_mode<synchronous>, transform_indices = @transform_6, window_bounds = array<i64: 1, 128>}, {transform_indices = @transform_7, window_bounds = array<i64: 16, 128>}]} {
    %c0 = arith.constant 0 : index
    %c0_0 = arith.constant 0 : index
    %0 = vector.load %arg1[%c0, %c0_0] : memref<16x128xf32, #tpu.memory_space<vmem>>, vector<16x128xf32>
    %c0_1 = arith.constant 0 : index
    %c0_2 = arith.constant 0 : index
    %1 = vector.load %arg2[%c0_1, %c0_2] : memref<128x128xbf16, #tpu.memory_space<vmem>>, vector<128x128xbf16>
    %c0_3 = arith.constant 0 : index
    %c0_4 = arith.constant 0 : index
    %2 = vector.load %arg3[%c0_3, %c0_4] : memref<1x128xf32, #tpu.memory_space<vmem>>, vector<1x128xf32>
    %3 = arith.truncf %0 : vector<16x128xf32> to vector<16x128xbf16>
    %cst = arith.constant dense<0.000000e+00> : vector<16x128xf32>
    %4 = tpu.matmul %3, %1, %cst {dimension_numbers = #tpu.dot_dimension_numbers<[1], [0], [0], [1], [0, 0, 1, 1], [], []>} : vector<16x128xbf16>, vector<128x128xbf16>, vector<16x128xf32> -> vector<16x128xf32>
    %5 = vector.broadcast %2 : vector<1x128xf32> to vector<16x128xf32>
    %6 = arith.addf %4, %5 : vector<16x128xf32>
    %cst_5 = arith.constant 0.000000e+00 : f32
    %7 = vector.broadcast %cst_5 : f32 to vector<16x128xf32>
    %8 = arith.maximumf %6, %7 : vector<16x128xf32>
    %c0_6 = arith.constant 0 : index
    %c0_7 = arith.constant 0 : index
    %9 = vector.load %arg4[%c0_6, %c0_7] : memref<128x128xbf16, #tpu.memory_space<vmem>>, vector<128x128xbf16>
    %c0_8 = arith.constant 0 : index
    %c0_9 = arith.constant 0 : index
    %10 = vector.load %arg5[%c0_8, %c0_9] : memref<1x128xf32, #tpu.memory_space<vmem>>, vector<1x128xf32>
    %11 = arith.truncf %8 : vector<16x128xf32> to vector<16x128xbf16>
    %cst_10 = arith.constant dense<0.000000e+00> : vector<16x128xf32>
    %12 = tpu.matmul %11, %9, %cst_10 {dimension_numbers = #tpu.dot_dimension_numbers<[1], [0], [0], [1], [0, 0, 1, 1], [], []>} : vector<16x128xbf16>, vector<128x128xbf16>, vector<16x128xf32> -> vector<16x128xf32>
    %13 = vector.broadcast %10 : vector<1x128xf32> to vector<16x128xf32>
    %14 = arith.addf %12, %13 : vector<16x128xf32>
    %cst_11 = arith.constant 0.000000e+00 : f32
    %15 = vector.broadcast %cst_11 : f32 to vector<16x128xf32>
    %16 = arith.maximumf %14, %15 : vector<16x128xf32>
    %c0_12 = arith.constant 0 : index
    %c0_13 = arith.constant 0 : index
    %17 = vector.load %arg6[%c0_12, %c0_13] : memref<128x128xbf16, #tpu.memory_space<vmem>>, vector<128x128xbf16>
    %c0_14 = arith.constant 0 : index
    %c0_15 = arith.constant 0 : index
    %18 = vector.load %arg7[%c0_14, %c0_15] : memref<1x128xf32, #tpu.memory_space<vmem>>, vector<1x128xf32>
    %19 = arith.truncf %16 : vector<16x128xf32> to vector<16x128xbf16>
    %cst_16 = arith.constant dense<0.000000e+00> : vector<16x128xf32>
    %20 = tpu.matmul %19, %17, %cst_16 {dimension_numbers = #tpu.dot_dimension_numbers<[1], [0], [0], [1], [0, 0, 1, 1], [], []>} : vector<16x128xbf16>, vector<128x128xbf16>, vector<16x128xf32> -> vector<16x128xf32>
    %21 = vector.broadcast %18 : vector<1x128xf32> to vector<16x128xf32>
    %22 = arith.addf %20, %21 : vector<16x128xf32>
    %c0_17 = arith.constant 0 : index
    %c0_18 = arith.constant 0 : index
    %23 = vector.load %arg8[%c0_17, %c0_18] : memref<16x128xf32, #tpu.memory_space<vmem>>, vector<16x128xf32>
    tpu.vector_store %arg8[%c0_17, %c0_18], %22 {strides = array<i32>} : memref<16x128xf32, #tpu.memory_space<vmem>>, vector<16x128xf32>,
    return
  }
  func.func @transform_0(%arg0: i32) -> (i32, i32) {
    %c0_i32 = arith.constant 0 : i32
    %c0_i32_0 = arith.constant 0 : i32
    return %arg0, %c0_i32 : i32, i32
  }
  func.func @transform_1(%arg0: i32) -> (i32, i32) {
    %c0_i32 = arith.constant 0 : i32
    %c0_i32_0 = arith.constant 0 : i32
    %c0_i32_1 = arith.constant 0 : i32
    return %c0_i32, %c0_i32_0 : i32, i32
  }
  func.func @transform_2(%arg0: i32) -> (i32, i32) {
    %c0_i32 = arith.constant 0 : i32
    %c0_i32_0 = arith.constant 0 : i32
    %c0_i32_1 = arith.constant 0 : i32
    return %c0_i32, %c0_i32_0 : i32, i32
  }
  func.func @transform_3(%arg0: i32) -> (i32, i32) {
    %c0_i32 = arith.constant 0 : i32
    %c0_i32_0 = arith.constant 0 : i32
    %c0_i32_1 = arith.constant 0 : i32
    return %c0_i32, %c0_i32_0 : i32, i32
  }
  func.func @transform_4(%arg0: i32) -> (i32, i32) {
    %c0_i32 = arith.constant 0 : i32
    %c0_i32_0 = arith.constant 0 : i32
    %c0_i32_1 = arith.constant 0 : i32
    return %c0_i32, %c0_i32_0 : i32, i32
  }
  func.func @transform_5(%arg0: i32) -> (i32, i32) {
    %c0_i32 = arith.constant 0 : i32
    %c0_i32_0 = arith.constant 0 : i32
    %c0_i32_1 = arith.constant 0 : i32
    return %c0_i32, %c0_i32_0 : i32, i32
  }
  func.func @transform_6(%arg0: i32) -> (i32, i32) {
    %c0_i32 = arith.constant 0 : i32
    %c0_i32_0 = arith.constant 0 : i32
    %c0_i32_1 = arith.constant 0 : i32
    return %c0_i32, %c0_i32_0 : i32, i32
  }
  func.func @transform_7(%arg0: i32) -> (i32, i32) {
    %c0_i32 = arith.constant 0 : i32
    %c0_i32_0 = arith.constant 0 : i32
    return %arg0, %c0_i32 : i32, i32
  }
}

module attributes {stable_mosaic.version = 11 : i64} {
  func.func @_mlp_kernel(%arg0: i32, %arg1: memref<16x128xf32, #tpu.memory_space<vmem>>, %arg2: memref<128x128xbf16, #tpu.memory_space<vmem>>, %arg3: memref<1x128xf32, #tpu.memory_space<vmem>>, %arg4: memref<128x128xbf16, #tpu.memory_space<vmem>>, %arg5: memref<1x128xf32, #tpu.memory_space<vmem>>, %arg6: memref<128x128xbf16, #tpu.memory_space<vmem>>, %arg7: memref<1x128xf32, #tpu.memory_space<vmem>>, %arg8: memref<16x128xf32, #tpu.memory_space<vmem>>) attributes {dimension_semantics = [#tpu.dimension_semantics<parallel>], iteration_bounds = array<i64: 1>, scalar_prefetch = 0 : i64, scratch_operands = 0 : i64, tpu.core_type = #tpu.core_type<tc>, window_params = [{transform_indices = @transform_0, window_bounds = array<i64: 16, 128>}, {pipeline_mode = #tpu.pipeline_mode<synchronous>, transform_indices = @transform_1, window_bounds = array<i64: 128, 128>}, {pipeline_mode = #tpu.pipeline_mode<synchronous>, transform_indices = @transform_2, window_bounds = array<i64: 1, 128>}, {pipeline_mode = #tpu.pipeline_mode<synchronous>, transform_indices = @transform_3, window_bounds = array<i64: 128, 128>}, {pipeline_mode = #tpu.pipeline_mode<synchronous>, transform_indices = @transform_4, window_bounds = array<i64: 1, 128>}, {pipeline_mode = #tpu.pipeline_mode<synchronous>, transform_indices = @transform_5, window_bounds = array<i64: 128, 128>}, {pipeline_mode = #tpu.pipeline_mode<synchronous>, transform_indices = @transform_6, window_bounds = array<i64: 1, 128>}, {transform_indices = @transform_7, window_bounds = array<i64: 16, 128>}]} {
    %c0 = arith.constant 0 : index
    %c0_0 = arith.constant 0 : index
    %0 = vector.load %arg1[%c0, %c0_0] : memref<16x128xf32, #tpu.memory_space<vmem>>, vector<16x128xf32>
    %c0_1 = arith.constant 0 : index
    %c0_2 = arith.constant 0 : index
    %1 = vector.load %arg2[%c0_1, %c0_2] : memref<128x128xbf16, #tpu.memory_space<vmem>>, vector<128x128xbf16>
    %c0_3 = arith.constant 0 : index
    %c0_4 = arith.constant 0 : index
    %2 = vector.load %arg3[%c0_3, %c0_4] : memref<1x128xf32, #tpu.memory_space<vmem>>, vector<1x128xf32>
    %3 = arith.truncf %0 : vector<16x128xf32> to vector<16x128xbf16>
    %cst = arith.constant dense<0.000000e+00> : vector<16x128xf32>
    %4 = tpu.matmul %3, %1, %cst {dimension_numbers = #tpu.dot_dimension_numbers<[1], [0], [0], [1], [0, 0, 1, 1], [], []>} : vector<16x128xbf16>, vector<128x128xbf16>, vector<16x128xf32> -> vector<16x128xf32>
    %5 = vector.broadcast %2 : vector<1x128xf32> to vector<16x128xf32>
    %6 = arith.addf %4, %5 : vector<16x128xf32>
    %cst_5 = arith.constant 0.000000e+00 : f32
    %7 = vector.broadcast %cst_5 : f32 to vector<16x128xf32>
    %8 = arith.maximumf %6, %7 : vector<16x128xf32>
    %c0_6 = arith.constant 0 : index
    %c0_7 = arith.constant 0 : index
    %9 = vector.load %arg4[%c0_6, %c0_7] : memref<128x128xbf16, #tpu.memory_space<vmem>>, vector<128x128xbf16>
    %c0_8 = arith.constant 0 : index
    %c0_9 = arith.constant 0 : index
    %10 = vector.load %arg5[%c0_8, %c0_9] : memref<1x128xf32, #tpu.memory_space<vmem>>, vector<1x128xf32>
    %11 = arith.truncf %8 : vector<16x128xf32> to vector<16x128xbf16>
    %cst_10 = arith.constant dense<0.000000e+00> : vector<16x128xf32>
    %12 = tpu.matmul %11, %9, %cst_10 {dimension_numbers = #tpu.dot_dimension_numbers<[1], [0], [0], [1], [0, 0, 1, 1], [], []>} : vector<16x128xbf16>, vector<128x128xbf16>, vector<16x128xf32> -> vector<16x128xf32>
    %13 = vector.broadcast %10 : vector<1x128xf32> to vector<16x128xf32>
    %14 = arith.addf %12, %13 : vector<16x128xf32>
    %cst_11 = arith.constant 0.000000e+00 : f32
    %15 = vector.broadcast %cst_11 : f32 to vector<16x128xf32>
    %16 = arith.maximumf %14, %15 : vector<16x128xf32>
    %c0_12 = arith.constant 0 : index
    %c0_13 = arith.constant 0 : index
    %17 = vector.load %arg6[%c0_12, %c0_13] : memref<128x128xbf16, #tpu.memory_space<vmem>>, vector<128x128xbf16>
    %c0_14 = arith.constant 0 : index
    %c0_15 = arith.constant 0 : index
    %18 = vector.load %arg7[%c0_14, %c0_15] : memref<1x128xf32, #tpu.memory_space<vmem>>, vector<1x128xf32>
    %19 = arith.truncf %16 : vector<16x128xf32> to vector<16x128xbf16>
    %cst_16 = arith.constant dense<0.000000e+00> : vector<16x128xf32>
    %20 = tpu.matmul %19, %17, %cst_16 {dimension_numbers = #tpu.dot_dimension_numbers<[1], [0], [0], [1], [0, 0, 1, 1], [], []>} : vector<16x128xbf16>, vector<128x128xbf16>, vector<16x128xf32> -> vector<16x128xf32>
    %21 = vector.broadcast %18 : vector<1x128xf32> to vector<16x128xf32>
    %22 = arith.addf %20, %21 : vector<16x128xf32>
    %c0_17 = arith.constant 0 : index
    %c0_18 = arith.constant 0 : index
    %23 = vector.load %arg8[%c0_17, %c0_18] : memref<16x128xf32, #tpu.memory_space<vmem>>, vector<16x128xf32>
    tpu.vector_store %arg8[%c0_17, %c0_18], %22 {strides = array<i32>} : memref<16x128xf32, #tpu.memory_space<vmem>>, vector<16x128xf32>,
    return
  }
  func.func @transform_0(%arg0: i32) -> (i32, i32) {
    %c0_i32 = arith.constant 0 : i32
    %c0_i32_0 = arith.constant 0 : i32
    return %arg0, %c0_i32 : i32, i32
  }
  func.func @transform_1(%arg0: i32) -> (i32, i32) {
    %c0_i32 = arith.constant 0 : i32
    %c0_i32_0 = arith.constant 0 : i32
    %c0_i32_1 = arith.constant 0 : i32
    return %c0_i32, %c0_i32_0 : i32, i32
  }
  func.func @transform_2(%arg0: i32) -> (i32, i32) {
    %c0_i32 = arith.constant 0 : i32
    %c0_i32_0 = arith.constant 0 : i32
    %c0_i32_1 = arith.constant 0 : i32
    return %c0_i32, %c0_i32_0 : i32, i32
  }
  func.func @transform_3(%arg0: i32) -> (i32, i32) {
    %c0_i32 = arith.constant 0 : i32
    %c0_i32_0 = arith.constant 0 : i32
    %c0_i32_1 = arith.constant 0 : i32
    return %c0_i32, %c0_i32_0 : i32, i32
  }
  func.func @transform_4(%arg0: i32) -> (i32, i32) {
    %c0_i32 = arith.constant 0 : i32
    %c0_i32_0 = arith.constant 0 : i32
    %c0_i32_1 = arith.constant 0 : i32
    return %c0_i32, %c0_i32_0 : i32, i32
  }
  func.func @transform_5(%arg0: i32) -> (i32, i32) {
    %c0_i32 = arith.constant 0 : i32
    %c0_i32_0 = arith.constant 0 : i32
    %c0_i32_1 = arith.constant 0 : i32
    return %c0_i32, %c0_i32_0 : i32, i32
  }
  func.func @transform_6(%arg0: i32) -> (i32, i32) {
    %c0_i32 = arith.constant 0 : i32
    %c0_i32_0 = arith.constant 0 : i32
    %c0_i32_1 = arith.constant 0 : i32
    return %c0_i32, %c0_i32_0 : i32, i32
  }
  func.func @transform_7(%arg0: i32) -> (i32, i32) {
    %c0_i32 = arith.constant 0 : i32
    %c0_i32_0 = arith.constant 0 : i32
    return %arg0, %c0_i32 : i32, i32
  }
}

</mosaic_0001>

<bundles_post_ra>
// kernel: tpu_custom_call.1
= control target key start
LH: loop header
LB: loop body
LE: loop exit
PB: predicated region body
PF: predicated region fallthrough
CT: control target
= control target key end

     0   :  { %12 = vsyncpa [#allocation3], 0  ;;  %s888_s0 = inlined_call_operand.hbm [shape: f32[16,128], index: 0, kind: input, shape index: {}]   ;;  %s889_s1 = inlined_call_operand.hbm [shape: bf16[128,128], index: 1, kind: input, shape index: {}]   ;;  %s890_s2 = inlined_call_operand.vmem [shape: f32[1,128], index: 2, kind: input, shape index: {}]   ;;  %s891_s3 = inlined_call_operand.hbm [shape: bf16[128,128], index: 3, kind: input, shape index: {}]   ;;  %s892_s4 = inlined_call_operand.vmem [shape: f32[1,128], index: 4, kind: input, shape index: {}]   ;;  %s893_s5 = inlined_call_operand.hbm [shape: bf16[128,128], index: 5, kind: input, shape index: {}]   ;;  %s894_s6 = inlined_call_operand.vmem [shape: f32[1,128], index: 6, kind: input, shape index: {}]   ;;  %s895_s7 = inlined_call_operand.hbm [shape: f32[16,128], index: 7, kind: output, shape index: {}]  }
   0x1   :  { %13 = vsyncpa [#allocation6], 0 }
   0x2   :  { %14 = vsyncpa [#allocation9], 0 }
   0x3   :  { %15 = vsyncpa [#allocation4], 0  ;;  %s716_s24 = smov [#allocation5]   ;;  %s598_s28 = scalar_lea.hbm %s889_s1, 1024 }
   0x4   :  { %s33_s25 = sshll.u32 %s716_s24, 4  ;;  %p599_p0 = scmp.ne.s32.totalorder %s889_s1, %s598_s28  ;;  %s34_s25 = int_to_ptr.vmem [resolvable:$true] %s33_s25 }
   0x5   :  { %p602_p1 = scmp.lt.u32.totalorder %s598_s28, %s889_s1 }
   0x7   :  { %p604_p2 = pnand %p602_p1, %p599_p0 }
   0x9   :  { %607 = shalt.err (!%p604_p2)
}
   0xa   :  { %s608_s10 = scalar_lea.vmem %s34_s25, 1024  ;;  %p613_p4 = scmp.lt.s32.totalorder %s34_s25, %s34_s25 }
   0xb   :  { %p609_p3 = scmp.ne.s32.totalorder %s34_s25, %s608_s10  ;;  %p614_p5 = scmp.lt.s32.totalorder %s608_s10, %s608_s10 }
   0xd   :  { %p615_p6 = por %p614_p5, %p613_p4 }
   0xf   :  { %p616_p7 = pnand %p615_p6, %p609_p3 }
  0x11   :  { %619 = shalt.err (!%p616_p7)
}
  0x12   :  { %s717_s11 = smov 64   ;;  %s718_s12 = smov 4  }
  0x13   :  { %39 = dma.hbm_to_vmem [thread:$0]  %s889_s1, 1024, %s34_s25, [#allocation6], %s717_s11, %s717_s11, %s718_s12  }
  0x14   :  { %s719_s15 = smov [#allocation2]   ;;  %s620_s19 = scalar_lea.hbm %s888_s0, 256 }
  0x15   :  { %s21_s16 = sshll.u32 %s719_s15, 4  ;;  %p621_p8 = scmp.ne.s32.totalorder %s888_s0, %s620_s19  ;;  %s22_s16 = int_to_ptr.vmem [resolvable:$true] %s21_s16 }
  0x16   :  { %p624_p9 = scmp.lt.u32.totalorder %s620_s19, %s888_s0 }
  0x18   :  { %p626_p10 = pnand %p624_p9, %p621_p8 }
  0x1a   :  { %629 = shalt.err (!%p626_p10)
}
  0x1b   :  { %s630_s24 = scalar_lea.vmem %s22_s16, 256  ;;  %p635_p12 = scmp.lt.s32.totalorder %s22_s16, %s22_s16 }
  0x1c   :  { %p631_p11 = scmp.ne.s32.totalorder %s22_s16, %s630_s24  ;;  %p636_p13 = scmp.lt.s32.totalorder %s630_s24, %s630_s24 }
  0x1e   :  { %p637_p0 = por %p636_p13, %p635_p12 }
  0x20   :  { %p638_p1 = pnand %p637_p0, %p631_p11 }
  0x22   :  { %641 = shalt.err (!%p638_p1)
}
  0x23   :  { %s720_s1 = smov 128   ;;  %s721_s25 = smov 8  }
  0x24   :  { %27 = dma.hbm_to_vmem [thread:$0]  %s888_s0, 256, %s22_s16, [#allocation3], %s720_s1, %s720_s1, %s721_s25  }
  0x25   :  { %s722_s28 = smov [#allocation7]   ;;  %s723_s30 = smov [#allocation8]  }
  0x26   :  { %s47_s29 = sshll.u32 %s722_s28, 4  ;;  %s61_s8 = sshll.u32 %s723_s30, 4  ;;  %s48_s29 = int_to_ptr.vmem [resolvable:$true] %s47_s29  ;;  %s797_s8 = int_to_ptr.vmem [resolvable:$true] %s61_s8 }
  0x27   :  { %s642_s13 = scalar_lea.hbm %s891_s3, 1024 }
  0x28   :  { %p643_p2 = scmp.ne.s32.totalorder %s891_s3, %s642_s13  ;;  %p646_p3 = scmp.lt.u32.totalorder %s642_s13, %s891_s3 }
  0x2a   :  { %p648_p4 = pnand %p646_p3, %p643_p2 }
  0x2c   :  { %651 = shalt.err (!%p648_p4)
}
  0x2d   :  { %s652_s0 = scalar_lea.vmem %s48_s29, 1024  ;;  %p657_p6 = scmp.lt.s32.totalorder %s48_s29, %s48_s29 }
  0x2e   :  { %p653_p5 = scmp.ne.s32.totalorder %s48_s29, %s652_s0  ;;  %p658_p7 = scmp.lt.s32.totalorder %s652_s0, %s652_s0 }
  0x30   :  { %p659_p8 = por %p658_p7, %p657_p6 }
  0x32   :  { %p660_p9 = pnand %p659_p8, %p653_p5 }
  0x34   :  { %663 = shalt.err (!%p660_p9)
}
  0x35   :  { %53 = dma.hbm_to_vmem [thread:$0]  %s891_s3, 1024, %s48_s29, [#allocation6], %s717_s11, %s717_s11, %s718_s12  }
  0x36   :  { %s664_s22 = scalar_lea.hbm %s893_s5, 1024 }
  0x37   :  { %p665_p10 = scmp.ne.s32.totalorder %s893_s5, %s664_s22  ;;  %p668_p11 = scmp.lt.u32.totalorder %s664_s22, %s893_s5 }
  0x39   :  { %p670_p12 = pnand %p668_p11, %p665_p10 }
  0x3b   :  { %673 = shalt.err (!%p670_p12)
}
  0x3c   :  { %s674_s28 = scalar_lea.vmem %s797_s8, 1024  ;;  %p679_p0 = scmp.lt.s32.totalorder %s797_s8, %s797_s8 }
  0x3d   :  { %p675_p13 = scmp.ne.s32.totalorder %s797_s8, %s674_s28  ;;  %p680_p1 = scmp.lt.s32.totalorder %s674_s28, %s674_s28 }
  0x3f   :  { %p681_p2 = por %p680_p1, %p679_p0 }
  0x41   :  { %p682_p3 = pnand %p681_p2, %p675_p13 }
  0x43   :  { %685 = shalt.err (!%p682_p3)
}
  0x44   :  { %67 = dma.hbm_to_vmem [thread:$0]  %s893_s5, 1024, %s797_s8, [#allocation9], %s717_s11, %s717_s11, %s718_s12  }
  0x45   :  { %708 = dma.done.wait [#allocation3], 256  }
  0x46   :  { %709 = vsyncadd [#allocation3], 4294967040 }
  0x47   :  { %710 = dma.done.wait [#allocation6], 2048  }
  0x48   :  { %711 = vsyncadd [#allocation6], 4294965248 }
  0x49   :  { %712 = dma.done.wait [#allocation9], 1024  }
  0x4a   :  { %713 = vsyncadd [#allocation9], 4294966272  ;;  %v724_v0 = vmov 0.0   ;;  %vm725_vm0 = vmmov 0   ;;  %v574_v1 = vld [vmem:[#allocation5] sm:$0xff]   ;;  %v575_v2 = vld [vmem:[#allocation5 + $0x8] sm:$0xff]  }
  0x4b   :  { %503 = vmatprep.subr.bf16.mxu0 %v724_v0  ;;  %519 = vmatprep.mubr.msk.bf16.mxu0 %vm725_vm0, %v724_v0  ;;  %v576_v3 = vld [vmem:[#allocation5 + $0x10] sm:$0xff]   ;;  %v582_v4 = vld [vmem:[#allocation7] sm:$0xff]   ;;  %v577_v5 = vld [vmem:[#allocation5 + $0x18] sm:$0xff]   ;;  %s726_s9 = smov [#allocation10]  }
  0x4c   :  { %523 = vmatprep.subr.bf16.mxu1 %v724_v0  ;;  %539 = vmatprep.mubr.msk.bf16.mxu1 %vm725_vm0, %v724_v0  ;;  %v583_v6 = vld [vmem:[#allocation7 + $0x8] sm:$0xff]   ;;  %v578_v7 = vld [vmem:[#allocation5 + $0x20] sm:$0xff]   ;;  %v584_v8 = vld [vmem:[#allocation7 + $0x10] sm:$0xff]   ;;  %s435_s10 = sshll.u32 %s726_s9, 4  ;;  %s436_s10 = int_to_ptr.vmem [resolvable:$true] %s435_s10 }
  0x4d   :  { %504 = vmatpush3.bf16.msra.mxu0 %v574_v1  ;;  %524 = vmatpush3.bf16.msra.mxu1 %v582_v4  ;;  %v579_v9 = vld [vmem:[#allocation5 + $0x28] sm:$0xff]   ;;  %v585_v10 = vld [vmem:[#allocation7 + $0x18] sm:$0xff]   ;;  %v580_v11 = vld [vmem:[#allocation5 + $0x30] sm:$0xff]   ;;  %p691_p5 = scmp.lt.s32.totalorder %s436_s10, %s436_s10 }
  0x4e   :  { %505 = vmatprep.subr.bf16.mxu0 %v724_v0  ;;  %525 = vmatprep.subr.bf16.mxu1 %v724_v0  ;;  %v586_v12 = vld [vmem:[#allocation7 + $0x20] sm:$0xff]   ;;  %v581_v13 = vld [vmem:[#allocation5 + $0x38] sm:$0xff]   ;;  %v83_v14 = vld [vmem:[#allocation2] sm:$0xff] }
  0x4f   :  { %v84_v15 = vld [vmem:[#allocation2 + $0x8] sm:$0xff]  ;;  %v587_v16 = vld [vmem:[#allocation7 + $0x28] sm:$0xff]   ;;  %v588_v18 = vld [vmem:[#allocation7 + $0x30] sm:$0xff]  }
  0x50   :  { %v102_v17 = vpack.c.bf16 %v84_v15, %v83_v14  ;;  %v589_v19 = vld [vmem:[#allocation7 + $0x38] sm:$0xff]   ;;  %v590_v20 = vld [vmem:[#allocation8] sm:$0xff]   ;;  %v591_v21 = vld [vmem:[#allocation8 + $0x8] sm:$0xff]  }
  0x51   :  { %506 = vmatpush3.bf16.msra.mxu0 %v575_v2  ;;  %526 = vmatpush3.bf16.msra.mxu1 %v583_v6  ;;  %v592_v22 = vld [vmem:[#allocation8 + $0x10] sm:$0xff]   ;;  %v593_v23 = vld [vmem:[#allocation8 + $0x18] sm:$0xff]   ;;  %v594_v24 = vld [vmem:[#allocation8 + $0x20] sm:$0xff]  }
  0x52   :  { %507 = vmatprep.subr.bf16.mxu0 %v724_v0  ;;  %527 = vmatprep.subr.bf16.mxu1 %v724_v0  ;;  %v595_v25 = vld [vmem:[#allocation8 + $0x28] sm:$0xff]   ;;  %v449_v26 = vld [vmem:[%s890_s2] ss:$0 sm:$0xff]  ;;  %v597_v37 = vld [vmem:[#allocation8 + $0x38] sm:$0xff]  }
  0x53   :  { %v596_v36 = vld [vmem:[#allocation8 + $0x30] sm:$0xff]  }
  0x54   :  { %v458_v38 = vld [vmem:[%s892_s4] ss:$0 sm:$0xff]  ;;  %s686_s4 = scalar_lea.vmem %s436_s10, 256 }
  0x55   :  { %508 = vmatpush3.bf16.msra.mxu0 %v576_v3  ;;  %528 = vmatpush3.bf16.msra.mxu1 %v584_v8  ;;  %v467_v48 = vld [vmem:[%s894_s6] ss:$0 sm:$0xff]  ;;  %p687_p4 = scmp.ne.s32.totalorder %s436_s10, %s686_s4  ;;  %p692_p6 = scmp.lt.s32.totalorder %s686_s4, %s686_s4 }
  0x56   :  { %509 = vmatprep.subr.bf16.mxu0 %v724_v0  ;;  %529 = vmatprep.subr.bf16.mxu1 %v724_v0 }
  0x57   :  { %p693_p7 = por %p692_p6, %p691_p5 }
  0x59   :  { %510 = vmatpush3.bf16.msra.mxu0 %v577_v5  ;;  %530 = vmatpush3.bf16.msra.mxu1 %v585_v10  ;;  %p694_p8 = pnand %p693_p7, %p687_p4 }
  0x5a   :  { %511 = vmatprep.subr.bf16.mxu0 %v724_v0  ;;  %531 = vmatprep.subr.bf16.mxu1 %v724_v0 }
  0x5d   :  { %512 = vmatpush3.bf16.msra.mxu0 %v578_v7  ;;  %532 = vmatpush3.bf16.msra.mxu1 %v586_v12 }
  0x5e   :  { %513 = vmatprep.subr.bf16.mxu0 %v724_v0  ;;  %533 = vmatprep.subr.bf16.mxu1 %v724_v0 }
  0x61   :  { %514 = vmatpush3.bf16.msra.mxu0 %v579_v9  ;;  %534 = vmatpush3.bf16.msra.mxu1 %v587_v16 }
  0x62   :  { %515 = vmatprep.subr.bf16.mxu0 %v724_v0  ;;  %535 = vmatprep.subr.bf16.mxu1 %v724_v0 }
  0x65   :  { %516 = vmatpush3.bf16.msra.mxu0 %v580_v11  ;;  %536 = vmatpush3.bf16.msra.mxu1 %v588_v18 }
  0x66   :  { %517 = vmatprep.subr.bf16.mxu0 %v724_v0  ;;  %537 = vmatprep.subr.bf16.mxu1 %v724_v0 }
  0x69   :  { %518 = vmatpush3.bf16.msra.mxu0 %v581_v13  ;;  %538 = vmatpush3.bf16.msra.mxu1 %v589_v19 }
  0x6a   :  { %543 = vmatprep.subr.bf16.mxu0 %v724_v0 }
  0x6c   :  { %520 = vmatmul.mubr.bf16.vlgmr.msra.gmra.mrb[0].mxu0 %v102_v17 }
  0x6d   :  { %559 = vmatprep.mubr.msk.bf16.mxu0 %vm725_vm0, %v724_v0  ;;  %544 = vmatpush3.bf16.msra.mxu0 %v590_v20 }
  0x6e   :  { %545 = vmatprep.subr.bf16.mxu0 %v724_v0 }
  0x71   :  { %546 = vmatpush3.bf16.msra.mxu0 %v591_v21 }
  0x72   :  { %547 = vmatprep.subr.bf16.mxu0 %v724_v0 }
  0x75   :  { %548 = vmatpush3.bf16.msra.mxu0 %v592_v22 }
  0x76   :  { %549 = vmatprep.subr.bf16.mxu0 %v724_v0 }
  0x79   :  { %550 = vmatpush3.bf16.msra.mxu0 %v593_v23 }
  0x7a   :  { %551 = vmatprep.subr.bf16.mxu0 %v724_v0 }
  0x7d   :  { %552 = vmatpush3.bf16.msra.mxu0 %v594_v24 }
  0x7e   :  { %553 = vmatprep.subr.bf16.mxu0 %v724_v0 }
  0x81   :  { %554 = vmatpush3.bf16.msra.mxu0 %v595_v25 }
  0x82   :  { %555 = vmatprep.subr.bf16.mxu0 %v724_v0 }
  0x85   :  { %556 = vmatpush3.bf16.msra.mxu0 %v596_v36 }
  0x86   :  { %557 = vmatprep.subr.bf16.mxu0 %v724_v0 }
  0x89   :  { %558 = vmatpush3.bf16.msra.mxu0 %v597_v37 }
 0x13f   :  { %v191_v27 = vpop.f32.mrb[0].mxu0 }
 0x140   :  { %v192_v28 = vadd.f32 %v449_v26, %v191_v27  ;;  %v521_v29 = vpop.f32.mrb[1].mxu0 }
 0x141   :  { %v194_v30 = vpop.f32.mrb[2].mxu0 }
 0x142   :  { %v195_v31 = vadd.f32 %v449_v26, %v194_v30  ;;  %v522_v32 = vpop.f32.mrb[3].mxu0  ;;  %v198_v33 = vmax.f32 %v192_v28, 0.0 }
 0x144   :  { %v199_v34 = vmax.f32 %v195_v31, 0.0 }
 0x146   :  { %v217_v35 = vpack.c.bf16 %v199_v34, %v198_v33 }
 0x148   :  { %540 = vmatmul.mubr.bf16.vlgmr.msra.gmra.mrb[0].mxu1 %v217_v35 }
 0x21b   :  { %v306_v39 = vpop.f32.mrb[0].mxu1 }
 0x21c   :  { %v307_v40 = vadd.f32 %v458_v38, %v306_v39  ;;  %v541_v41 = vpop.f32.mrb[1].mxu1 }
 0x21d   :  { %v309_v42 = vpop.f32.mrb[2].mxu1 }
 0x21e   :  { %v310_v43 = vadd.f32 %v458_v38, %v309_v42  ;;  %v542_v44 = vpop.f32.mrb[3].mxu1  ;;  %v313_v45 = vmax.f32 %v307_v40, 0.0 }
 0x220   :  { %v314_v46 = vmax.f32 %v310_v43, 0.0 }
 0x222   :  { %v332_v47 = vpack.c.bf16 %v314_v46, %v313_v45 }
 0x224   :  { %560 = vmatmul.mubr.bf16.vlgmr.msra.gmra.mrb[4].mxu0 %v332_v47 }
 0x2f7   :  { %v421_v49 = vpop.f32.mrb[4].mxu0 }
 0x2f8   :  { %v422_v50 = vadd.f32 %v467_v48, %v421_v49  ;;  %v561_v51 = vpop.f32.mrb[5].mxu0 }
 0x2f9   :  { %v424_v52 = vpop.f32.mrb[6].mxu0 }
 0x2fa   :  { %428 = vst [vmem:[#allocation10] sm:$0xff] %v422_v50  ;;  %v425_v53 = vadd.f32 %v467_v48, %v424_v52  ;;  %v562_v54 = vpop.f32.mrb[7].mxu0 }
 0x2fc   :  { %429 = vst [vmem:[#allocation10 + $0x8] sm:$0xff] %v425_v53 }
 0x2fd   :  { %697 = shalt.err (!%p694_p8)
}
 0x2fe   :  { %s698_s14 = scalar_lea.hbm %s895_s7, 256 }
 0x2ff   :  { %p699_p9 = scmp.ne.s32.totalorder %s895_s7, %s698_s14  ;;  %p702_p10 = scmp.lt.u32.totalorder %s698_s14, %s895_s7 }
 0x301   :  { %p704_p11 = pnand %p702_p10, %p699_p9 }
 0x303   :  { %707 = shalt.err (!%p704_p11)
}
 0x304   :  { %441 = dma.vmem_to_hbm [thread:$0]  %s436_s10, 256, %s895_s7, [#allocation4], %s720_s1, %s720_s1, %s721_s25  }
 0x305   :  { %714 = dma.done.wait [#allocation4], 256  }
 0x306   :  { %715 = vsyncadd [#allocation4], 4294967040 }
 0x307   :  { %445 = vsyncpa [#allocation3], 1 }
 0x308   :  { %446 = vsyncpa [#allocation6], 1 }
 0x309   :  { %447 = vsyncpa [#allocation9], 1 }
 0x30a   :  { %448 = vsyncpa [#allocation4], 1 }

// kernel: tpu_custom_call.1
= control target key start
LH: loop header
LB: loop body
LE: loop exit
PB: predicated region body
PF: predicated region fallthrough
CT: control target
= control target key end

     0   :  { %12 = vsyncpa [#allocation3], 0  ;;  %s888_s0 = inlined_call_operand.hbm [shape: f32[16,128], index: 0, kind: input, shape index: {}]   ;;  %s889_s1 = inlined_call_operand.hbm [shape: bf16[128,128], index: 1, kind: input, shape index: {}]   ;;  %s890_s2 = inlined_call_operand.vmem [shape: f32[1,128], index: 2, kind: input, shape index: {}]   ;;  %s891_s3 = inlined_call_operand.hbm [shape: bf16[128,128], index: 3, kind: input, shape index: {}]   ;;  %s892_s4 = inlined_call_operand.vmem [shape: f32[1,128], index: 4, kind: input, shape index: {}]   ;;  %s893_s5 = inlined_call_operand.hbm [shape: bf16[128,128], index: 5, kind: input, shape index: {}]   ;;  %s894_s6 = inlined_call_operand.vmem [shape: f32[1,128], index: 6, kind: input, shape index: {}]   ;;  %s895_s7 = inlined_call_operand.hbm [shape: f32[16,128], index: 7, kind: output, shape index: {}]  }
   0x1   :  { %13 = vsyncpa [#allocation6], 0 }
   0x2   :  { %14 = vsyncpa [#allocation9], 0 }
   0x3   :  { %15 = vsyncpa [#allocation4], 0  ;;  %s716_s24 = smov [#allocation5]   ;;  %s598_s28 = scalar_lea.hbm %s889_s1, 1024 }
   0x4   :  { %s33_s25 = sshll.u32 %s716_s24, 4  ;;  %p599_p0 = scmp.ne.s32.totalorder %s889_s1, %s598_s28  ;;  %s34_s25 = int_to_ptr.vmem [resolvable:$true] %s33_s25 }
   0x5   :  { %p602_p1 = scmp.lt.u32.totalorder %s598_s28, %s889_s1 }
   0x7   :  { %p604_p2 = pnand %p602_p1, %p599_p0 }
   0x9   :  { %607 = shalt.err (!%p604_p2)
}
   0xa   :  { %s608_s10 = scalar_lea.vmem %s34_s25, 1024  ;;  %p613_p4 = scmp.lt.s32.totalorder %s34_s25, %s34_s25 }
   0xb   :  { %p609_p3 = scmp.ne.s32.totalorder %s34_s25, %s608_s10  ;;  %p614_p5 = scmp.lt.s32.totalorder %s608_s10, %s608_s10 }
   0xd   :  { %p615_p6 = por %p614_p5, %p613_p4 }
   0xf   :  { %p616_p7 = pnand %p615_p6, %p609_p3 }
  0x11   :  { %619 = shalt.err (!%p616_p7)
}
  0x12   :  { %s717_s11 = smov 64   ;;  %s718_s12 = smov 4  }
  0x13   :  { %39 = dma.hbm_to_vmem [thread:$0]  %s889_s1, 1024, %s34_s25, [#allocation6], %s717_s11, %s717_s11, %s718_s12  }
  0x14   :  { %s719_s15 = smov [#allocation2]   ;;  %s620_s19 = scalar_lea.hbm %s888_s0, 256 }
  0x15   :  { %s21_s16 = sshll.u32 %s719_s15, 4  ;;  %p621_p8 = scmp.ne.s32.totalorder %s888_s0, %s620_s19  ;;  %s22_s16 = int_to_ptr.vmem [resolvable:$true] %s21_s16 }
  0x16   :  { %p624_p9 = scmp.lt.u32.totalorder %s620_s19, %s888_s0 }
  0x18   :  { %p626_p10 = pnand %p624_p9, %p621_p8 }
  0x1a   :  { %629 = shalt.err (!%p626_p10)
}
  0x1b   :  { %s630_s24 = scalar_lea.vmem %s22_s16, 256  ;;  %p635_p12 = scmp.lt.s32.totalorder %s22_s16, %s22_s16 }
  0x1c   :  { %p631_p11 = scmp.ne.s32.totalorder %s22_s16, %s630_s24  ;;  %p636_p13 = scmp.lt.s32.totalorder %s630_s24, %s630_s24 }
  0x1e   :  { %p637_p0 = por %p636_p13, %p635_p12 }
  0x20   :  { %p638_p1 = pnand %p637_p0, %p631_p11 }
  0x22   :  { %641 = shalt.err (!%p638_p1)
}
  0x23   :  { %s720_s1 = smov 128   ;;  %s721_s25 = smov 8  }
  0x24   :  { %27 = dma.hbm_to_vmem [thread:$0]  %s888_s0, 256, %s22_s16, [#allocation3], %s720_s1, %s720_s1, %s721_s25  }
  0x25   :  { %s722_s28 = smov [#allocation7]   ;;  %s723_s30 = smov [#allocation8]  }
  0x26   :  { %s47_s29 = sshll.u32 %s722_s28, 4  ;;  %s61_s8 = sshll.u32 %s723_s30, 4  ;;  %s48_s29 = int_to_ptr.vmem [resolvable:$true] %s47_s29  ;;  %s797_s8 = int_to_ptr.vmem [resolvable:$true] %s61_s8 }
  0x27   :  { %s642_s13 = scalar_lea.hbm %s891_s3, 1024 }
  0x28   :  { %p643_p2 = scmp.ne.s32.totalorder %s891_s3, %s642_s13  ;;  %p646_p3 = scmp.lt.u32.totalorder %s642_s13, %s891_s3 }
  0x2a   :  { %p648_p4 = pnand %p646_p3, %p643_p2 }
  0x2c   :  { %651 = shalt.err (!%p648_p4)
}
  0x2d   :  { %s652_s0 = scalar_lea.vmem %s48_s29, 1024  ;;  %p657_p6 = scmp.lt.s32.totalorder %s48_s29, %s48_s29 }
  0x2e   :  { %p653_p5 = scmp.ne.s32.totalorder %s48_s29, %s652_s0  ;;  %p658_p7 = scmp.lt.s32.totalorder %s652_s0, %s652_s0 }
  0x30   :  { %p659_p8 = por %p658_p7, %p657_p6 }
  0x32   :  { %p660_p9 = pnand %p659_p8, %p653_p5 }
  0x34   :  { %663 = shalt.err (!%p660_p9)
}
  0x35   :  { %53 = dma.hbm_to_vmem [thread:$0]  %s891_s3, 1024, %s48_s29, [#allocation6], %s717_s11, %s717_s11, %s718_s12  }
  0x36   :  { %s664_s22 = scalar_lea.hbm %s893_s5, 1024 }
  0x37   :  { %p665_p10 = scmp.ne.s32.totalorder %s893_s5, %s664_s22  ;;  %p668_p11 = scmp.lt.u32.totalorder %s664_s22, %s893_s5 }
  0x39   :  { %p670_p12 = pnand %p668_p11, %p665_p10 }
  0x3b   :  { %673 = shalt.err (!%p670_p12)
}
  0x3c   :  { %s674_s28 = scalar_lea.vmem %s797_s8, 1024  ;;  %p679_p0 = scmp.lt.s32.totalorder %s797_s8, %s797_s8 }
  0x3d   :  { %p675_p13 = scmp.ne.s32.totalorder %s797_s8, %s674_s28  ;;  %p680_p1 = scmp.lt.s32.totalorder %s674_s28, %s674_s28 }
  0x3f   :  { %p681_p2 = por %p680_p1, %p679_p0 }
  0x41   :  { %p682_p3 = pnand %p681_p2, %p675_p13 }
  0x43   :  { %685 = shalt.err (!%p682_p3)
}
  0x44   :  { %67 = dma.hbm_to_vmem [thread:$0]  %s893_s5, 1024, %s797_s8, [#allocation9], %s717_s11, %s717_s11, %s718_s12  }
  0x45   :  { %708 = dma.done.wait [#allocation3], 256  }
  0x46   :  { %709 = vsyncadd [#allocation3], 4294967040 }
  0x47   :  { %710 = dma.done.wait [#allocation6], 2048  }
  0x48   :  { %711 = vsyncadd [#allocation6], 4294965248 }
  0x49   :  { %712 = dma.done.wait [#allocation9], 1024  }
  0x4a   :  { %713 = vsyncadd [#allocation9], 4294966272  ;;  %v724_v0 = vmov 0.0   ;;  %vm725_vm0 = vmmov 0   ;;  %v574_v1 = vld [vmem:[#allocation5] sm:$0xff]   ;;  %v575_v2 = vld [vmem:[#allocation5 + $0x8] sm:$0xff]  }
  0x4b   :  { %503 = vmatprep.subr.bf16.mxu0 %v724_v0  ;;  %519 = vmatprep.mubr.msk.bf16.mxu0 %vm725_vm0, %v724_v0  ;;  %v576_v3 = vld [vmem:[#allocation5 + $0x10] sm:$0xff]   ;;  %v582_v4 = vld [vmem:[#allocation7] sm:$0xff]   ;;  %v577_v5 = vld [vmem:[#allocation5 + $0x18] sm:$0xff]   ;;  %s726_s9 = smov [#allocation10]  }
  0x4c   :  { %523 = vmatprep.subr.bf16.mxu1 %v724_v0  ;;  %539 = vmatprep.mubr.msk.bf16.mxu1 %vm725_vm0, %v724_v0  ;;  %v583_v6 = vld [vmem:[#allocation7 + $0x8] sm:$0xff]   ;;  %v578_v7 = vld [vmem:[#allocation5 + $0x20] sm:$0xff]   ;;  %v584_v8 = vld [vmem:[#allocation7 + $0x10] sm:$0xff]   ;;  %s435_s10 = sshll.u32 %s726_s9, 4  ;;  %s436_s10 = int_to_ptr.vmem [resolvable:$true] %s435_s10 }
  0x4d   :  { %504 = vmatpush3.bf16.msra.mxu0 %v574_v1  ;;  %524 = vmatpush3.bf16.msra.mxu1 %v582_v4  ;;  %v579_v9 = vld [vmem:[#allocation5 + $0x28] sm:$0xff]   ;;  %v585_v10 = vld [vmem:[#allocation7 + $0x18] sm:$0xff]   ;;  %v580_v11 = vld [vmem:[#allocation5 + $0x30] sm:$0xff]   ;;  %p691_p5 = scmp.lt.s32.totalorder %s436_s10, %s436_s10 }
  0x4e   :  { %505 = vmatprep.subr.bf16.mxu0 %v724_v0  ;;  %525 = vmatprep.subr.bf16.mxu1 %v724_v0  ;;  %v586_v12 = vld [vmem:[#allocation7 + $0x20] sm:$0xff]   ;;  %v581_v13 = vld [vmem:[#allocation5 + $0x38] sm:$0xff]   ;;  %v83_v14 = vld [vmem:[#allocation2] sm:$0xff] }
  0x4f   :  { %v84_v15 = vld [vmem:[#allocation2 + $0x8] sm:$0xff]  ;;  %v587_v16 = vld [vmem:[#allocation7 + $0x28] sm:$0xff]   ;;  %v588_v18 = vld [vmem:[#allocation7 + $0x30] sm:$0xff]  }
  0x50   :  { %v102_v17 = vpack.c.bf16 %v84_v15, %v83_v14  ;;  %v589_v19 = vld [vmem:[#allocation7 + $0x38] sm:$0xff]   ;;  %v590_v20 = vld [vmem:[#allocation8] sm:$0xff]   ;;  %v591_v21 = vld [vmem:[#allocation8 + $0x8] sm:$0xff]  }
  0x51   :  { %506 = vmatpush3.bf16.msra.mxu0 %v575_v2  ;;  %526 = vmatpush3.bf16.msra.mxu1 %v583_v6  ;;  %v592_v22 = vld [vmem:[#allocation8 + $0x10] sm:$0xff]   ;;  %v593_v23 = vld [vmem:[#allocation8 + $0x18] sm:$0xff]   ;;  %v594_v24 = vld [vmem:[#allocation8 + $0x20] sm:$0xff]  }
  0x52   :  { %507 = vmatprep.subr.bf16.mxu0 %v724_v0  ;;  %527 = vmatprep.subr.bf16.mxu1 %v724_v0  ;;  %v595_v25 = vld [vmem:[#allocation8 + $0x28] sm:$0xff]   ;;  %v449_v26 = vld [vmem:[%s890_s2] ss:$0 sm:$0xff]  ;;  %v597_v37 = vld [vmem:[#allocation8 + $0x38] sm:$0xff]  }
  0x53   :  { %v596_v36 = vld [vmem:[#allocation8 + $0x30] sm:$0xff]  }
  0x54   :  { %v458_v38 = vld [vmem:[%s892_s4] ss:$0 sm:$0xff]  ;;  %s686_s4 = scalar_lea.vmem %s436_s10, 256 }
  0x55   :  { %508 = vmatpush3.bf16.msra.mxu0 %v576_v3  ;;  %528 = vmatpush3.bf16.msra.mxu1 %v584_v8  ;;  %v467_v48 = vld [vmem:[%s894_s6] ss:$0 sm:$0xff]  ;;  %p687_p4 = scmp.ne.s32.totalorder %s436_s10, %s686_s4  ;;  %p692_p6 = scmp.lt.s32.totalorder %s686_s4, %s686_s4 }
  0x56   :  { %509 = vmatprep.subr.bf16.mxu0 %v724_v0  ;;  %529 = vmatprep.subr.bf16.mxu1 %v724_v0 }
  0x57   :  { %p693_p7 = por %p692_p6, %p691_p5 }
  0x59   :  { %510 = vmatpush3.bf16.msra.mxu0 %v577_v5  ;;  %530 = vmatpush3.bf16.msra.mxu1 %v585_v10  ;;  %p694_p8 = pnand %p693_p7, %p687_p4 }
  0x5a   :  { %511 = vmatprep.subr.bf16.mxu0 %v724_v0  ;;  %531 = vmatprep.subr.bf16.mxu1 %v724_v0 }
  0x5d   :  { %512 = vmatpush3.bf16.msra.mxu0 %v578_v7  ;;  %532 = vmatpush3.bf16.msra.mxu1 %v586_v12 }
  0x5e   :  { %513 = vmatprep.subr.bf16.mxu0 %v724_v0  ;;  %533 = vmatprep.subr.bf16.mxu1 %v724_v0 }
  0x61   :  { %514 = vmatpush3.bf16.msra.mxu0 %v579_v9  ;;  %534 = vmatpush3.bf16.msra.mxu1 %v587_v16 }
  0x62   :  { %515 = vmatprep.subr.bf16.mxu0 %v724_v0  ;;  %535 = vmatprep.subr.bf16.mxu1 %v724_v0 }
  0x65   :  { %516 = vmatpush3.bf16.msra.mxu0 %v580_v11  ;;  %536 = vmatpush3.bf16.msra.mxu1 %v588_v18 }
  0x66   :  { %517 = vmatprep.subr.bf16.mxu0 %v724_v0  ;;  %537 = vmatprep.subr.bf16.mxu1 %v724_v0 }
  0x69   :  { %518 = vmatpush3.bf16.msra.mxu0 %v581_v13  ;;  %538 = vmatpush3.bf16.msra.mxu1 %v589_v19 }
  0x6a   :  { %543 = vmatprep.subr.bf16.mxu0 %v724_v0 }
  0x6c   :  { %520 = vmatmul.mubr.bf16.vlgmr.msra.gmra.mrb[0].mxu0 %v102_v17 }
  0x6d   :  { %559 = vmatprep.mubr.msk.bf16.mxu0 %vm725_vm0, %v724_v0  ;;  %544 = vmatpush3.bf16.msra.mxu0 %v590_v20 }
  0x6e   :  { %545 = vmatprep.subr.bf16.mxu0 %v724_v0 }
  0x71   :  { %546 = vmatpush3.bf16.msra.mxu0 %v591_v21 }
  0x72   :  { %547 = vmatprep.subr.bf16.mxu0 %v724_v0 }
  0x75   :  { %548 = vmatpush3.bf16.msra.mxu0 %v592_v22 }
  0x76   :  { %549 = vmatprep.subr.bf16.mxu0 %v724_v0 }
  0x79   :  { %550 = vmatpush3.bf16.msra.mxu0 %v593_v23 }
  0x7a   :  { %551 = vmatprep.subr.bf16.mxu0 %v724_v0 }
  0x7d   :  { %552 = vmatpush3.bf16.msra.mxu0 %v594_v24 }
  0x7e   :  { %553 = vmatprep.subr.bf16.mxu0 %v724_v0 }
  0x81   :  { %554 = vmatpush3.bf16.msra.mxu0 %v595_v25 }
  0x82   :  { %555 = vmatprep.subr.bf16.mxu0 %v724_v0 }
  0x85   :  { %556 = vmatpush3.bf16.msra.mxu0 %v596_v36 }
  0x86   :  { %557 = vmatprep.subr.bf16.mxu0 %v724_v0 }
  0x89   :  { %558 = vmatpush3.bf16.msra.mxu0 %v597_v37 }
 0x13f   :  { %v191_v27 = vpop.f32.mrb[0].mxu0 }
 0x140   :  { %v192_v28 = vadd.f32 %v449_v26, %v191_v27  ;;  %v521_v29 = vpop.f32.mrb[1].mxu0 }
 0x141   :  { %v194_v30 = vpop.f32.mrb[2].mxu0 }
 0x142   :  { %v195_v31 = vadd.f32 %v449_v26, %v194_v30  ;;  %v522_v32 = vpop.f32.mrb[3].mxu0  ;;  %v198_v33 = vmax.f32 %v192_v28, 0.0 }
 0x144   :  { %v199_v34 = vmax.f32 %v195_v31, 0.0 }
 0x146   :  { %v217_v35 = vpack.c.bf16 %v199_v34, %v198_v33 }
 0x148   :  { %540 = vmatmul.mubr.bf16.vlgmr.msra.gmra.mrb[0].mxu1 %v217_v35 }
 0x21b   :  { %v306_v39 = vpop.f32.mrb[0].mxu1 }
 0x21c   :  { %v307_v40 = vadd.f32 %v458_v38, %v306_v39  ;;  %v541_v41 = vpop.f32.mrb[1].mxu1 }
 0x21d   :  { %v309_v42 = vpop.f32.mrb[2].mxu1 }
 0x21e   :  { %v310_v43 = vadd.f32 %v458_v38, %v309_v42  ;;  %v542_v44 = vpop.f32.mrb[3].mxu1  ;;  %v313_v45 = vmax.f32 %v307_v40, 0.0 }
 0x220   :  { %v314_v46 = vmax.f32 %v310_v43, 0.0 }
 0x222   :  { %v332_v47 = vpack.c.bf16 %v314_v46, %v313_v45 }
 0x224   :  { %560 = vmatmul.mubr.bf16.vlgmr.msra.gmra.mrb[4].mxu0 %v332_v47 }
 0x2f7   :  { %v421_v49 = vpop.f32.mrb[4].mxu0 }
 0x2f8   :  { %v422_v50 = vadd.f32 %v467_v48, %v421_v49  ;;  %v561_v51 = vpop.f32.mrb[5].mxu0 }
 0x2f9   :  { %v424_v52 = vpop.f32.mrb[6].mxu0 }
 0x2fa   :  { %428 = vst [vmem:[#allocation10] sm:$0xff] %v422_v50  ;;  %v425_v53 = vadd.f32 %v467_v48, %v424_v52  ;;  %v562_v54 = vpop.f32.mrb[7].mxu0 }
 0x2fc   :  { %429 = vst [vmem:[#allocation10 + $0x8] sm:$0xff] %v425_v53 }
 0x2fd   :  { %697 = shalt.err (!%p694_p8)
}
 0x2fe   :  { %s698_s14 = scalar_lea.hbm %s895_s7, 256 }
 0x2ff   :  { %p699_p9 = scmp.ne.s32.totalorder %s895_s7, %s698_s14  ;;  %p702_p10 = scmp.lt.u32.totalorder %s698_s14, %s895_s7 }
 0x301   :  { %p704_p11 = pnand %p702_p10, %p699_p9 }
 0x303   :  { %707 = shalt.err (!%p704_p11)
}
 0x304   :  { %441 = dma.vmem_to_hbm [thread:$0]  %s436_s10, 256, %s895_s7, [#allocation4], %s720_s1, %s720_s1, %s721_s25  }
 0x305   :  { %714 = dma.done.wait [#allocation4], 256  }
 0x306   :  { %715 = vsyncadd [#allocation4], 4294967040 }
 0x307   :  { %445 = vsyncpa [#allocation3], 1 }
 0x308   :  { %446 = vsyncpa [#allocation6], 1 }
 0x309   :  { %447 = vsyncpa [#allocation9], 1 }
 0x30a   :  { %448 = vsyncpa [#allocation4], 1 }

</bundles_post_ra>
